<compile_context>
chip_gen: v7x
topology: tpu7x:2x2x1
jax: 0.10.0
libtpu: 0.0.40
codegen_flags: <defaults>
</compile_context>

<pallas_src>
import functools
import math

import jax
import jax.numpy as jnp
from jax.experimental import pallas as pl
from jax.experimental.pallas import tpu as pltpu

# ---------------- config (small synthetic BERT) ----------------
VOCAB = 64
HIDDEN = 32
N_LAYERS = 2
N_HEADS = 2
HEAD_DIM = HIDDEN // N_HEADS
INTERMEDIATE = 64
MAX_POS = 16
NUM_CLASSES = 4
LN_EPS = 1e-12
LANE_PAD = 128          # lane-dense padding (multiple of 128)


# ---------------- in-kernel helpers ----------------
def _layernorm(x, gamma, beta):
    """LayerNorm over last dim, f32 math."""
    mean = jnp.mean(x, axis=-1, keepdims=True)
    xc = x - mean
    var = jnp.mean(xc * xc, axis=-1, keepdims=True)
    return (xc * jax.lax.rsqrt(var + LN_EPS)) * gamma + beta


# ---------------- fused encoder kernel (all layers, one call) ----------------
def _encoder_kernel(x_ref, mask_ref, embv_ref, wqkv_ref, wo_ref, wi_ref, wo2_ref,
                    vec_ref, o_ref, x_sc, *, S, H, Dh):
    """grid = (batch, layer). One full post-LN BERT layer per invocation; the
    activation slab stays resident in VMEM scratch across the layer axis."""
    l = pl.program_id(1)
    n_layers = pl.num_programs(1)
    hidden = H * Dh
    scale = 1.0 / math.sqrt(Dh)

    # Layer 0: fused embedding LayerNorm seeds the resident activation scratch.
    @pl.when(l == 0)
    def _():
        ev = embv_ref[...]                                  # (2, hidden): [gamma; beta]
        x_sc[...] = _layernorm(x_ref[...], ev[0:1, :], ev[1:2, :])

    x = x_sc[...]                                           # (S, hidden) f32

    # packed per-layer small vectors: one DMA, static slices in-kernel
    vec = vec_ref[...]                                      # (8, LANE_PAD) f32
    bqkv = vec[0:1, :3 * hidden]
    bo = vec[1:2, :hidden]
    g1, b1 = vec[2:3, :hidden], vec[3:4, :hidden]
    bi = vec[4:5, :INTERMEDIATE]
    bo2 = vec[5:6, :hidden]
    g2, b2 = vec[6:7, :hidden], vec[7:8, :hidden]

    # fused QKV projection: a single MXU pass produces q, k, v for all heads
    qkv = jnp.dot(x.astype(jnp.bfloat16), wqkv_ref[...],
                  preferred_element_type=jnp.float32) + bqkv

    # all heads in ONE batched dot_general (no per-head loop / concatenate);
    # 1/sqrt(Dh) folded into q before the score matmul
    q = (qkv[:, :hidden] * scale).reshape(S, H, Dh)
    k = qkv[:, hidden:2 * hidden].reshape(S, H, Dh)
    v = qkv[:, 2 * hidden:].reshape(S, H, Dh)
    q = jnp.transpose(q, (1, 0, 2))                         # (H, S, Dh)
    k = jnp.transpose(k, (1, 0, 2))
    v = jnp.transpose(v, (1, 0, 2))

    s = jnp.einsum('hqd,hkd->hqk', q.astype(jnp.bfloat16), k.astype(jnp.bfloat16),
                   preferred_element_type=jnp.float32)      # (H, S, S)
    s = s + mask_ref[...][None, :, :]                       # (1,1,S) additive mask
    s = s - jnp.max(s, axis=-1, keepdims=True)
    p = jnp.exp(s)
    p = p * pl.reciprocal(jnp.sum(p, axis=-1, keepdims=True), approx=True)
    ctx = jnp.einsum('hqk,hkd->hqd', p.astype(jnp.bfloat16), v.astype(jnp.bfloat16),
                     preferred_element_type=jnp.float32)    # (H, S, Dh)
    ctx2d = jnp.transpose(ctx, (1, 0, 2)).reshape(S, hidden)

    attn = jnp.dot(ctx2d.astype(jnp.bfloat16), wo_ref[...],
                   preferred_element_type=jnp.float32) + bo
    y = _layernorm(x + attn, g1, b1)

    ffn = jnp.dot(y.astype(jnp.bfloat16), wi_ref[...],
                  preferred_element_type=jnp.float32) + bi
    # TODO(synk): PyTorch BERT uses erf-gelu; tanh-approx gelu (EUP tanh) keeps a
    # safe lowering path and introduces only tiny drift.
    ffn = jax.nn.gelu(ffn)
    ffn = jnp.dot(ffn.astype(jnp.bfloat16), wo2_ref[...],
                  preferred_element_type=jnp.float32) + bo2
    out = _layernorm(y + ffn, g2, b2)
    x_sc[...] = out                                         # carry to next layer

    # Last layer: single lane-dense 128-wide padded HBM store per batch block.
    @pl.when(l == n_layers - 1)
    def _():
        pad = jnp.zeros((S, LANE_PAD - hidden), jnp.float32)
        o_ref[...] = jnp.concatenate([out, pad], axis=-1)


def encoder(x_emb, add_mask3, params):
    """x_emb: (B, S, HIDDEN) f32 summed embeddings; add_mask3: (B, 1, S) additive."""
    B, S, _ = x_emb.shape
    kernel = functools.partial(_encoder_kernel, S=S, H=N_HEADS, Dh=HEAD_DIM)
    return pl.pallas_call(
        kernel,
        out_shape=jax.ShapeDtypeStruct((B, S, LANE_PAD), jnp.float32),
        grid_spec=pltpu.PrefetchScalarGridSpec(
            num_scalar_prefetch=0,
            grid=(B, N_LAYERS),                               # layer axis innermost
            in_specs=[
                pl.BlockSpec((None, S, HIDDEN), lambda b, l: (b, 0, 0)),        # x
                pl.BlockSpec((None, 1, S), lambda b, l: (b, 0, 0)),             # mask
                pl.BlockSpec((2, HIDDEN), lambda b, l: (0, 0)),                 # emb LN
                pl.BlockSpec((None, HIDDEN, 3 * HIDDEN), lambda b, l: (l, 0, 0)),   # Wqkv
                pl.BlockSpec((None, HIDDEN, HIDDEN), lambda b, l: (l, 0, 0)),       # Wo
                pl.BlockSpec((None, HIDDEN, INTERMEDIATE), lambda b, l: (l, 0, 0)), # Wi
                pl.BlockSpec((None, INTERMEDIATE, HIDDEN), lambda b, l: (l, 0, 0)), # Wo2
                pl.BlockSpec((None, 8, LANE_PAD), lambda b, l: (l, 0, 0)),          # packed vecs
            ],
            out_specs=pl.BlockSpec((None, S, LANE_PAD), lambda b, l: (b, 0, 0)),
            scratch_shapes=[pltpu.VMEM((S, HIDDEN), jnp.float32)],   # resident activations
        ),
        compiler_params=pltpu.CompilerParams(
            dimension_semantics=("parallel", "arbitrary"),   # batch across TCs on v7x
            # toy config uses KBs; re-budget against 64 MiB (v7x) if shapes grow
            vmem_limit_bytes=32 * 1024 * 1024,
        ),
    )(x_emb, add_mask3, params["emb_vec"], params["wqkv"], params["wo"],
      params["wi"], params["wo2"], params["vec"])


# ---------------- head kernels (fused dense chains, lane-dense outputs) -------
def _mlm_head_kernel(x_ref, w1_ref, wd_ref, vec_ref, o_ref):
    """MLM head: dense+gelu -> LayerNorm -> decoder; padded 128-wide logits."""
    vec = vec_ref[...]
    b1 = vec[0:1, :HIDDEN]
    g, b = vec[1:2, :HIDDEN], vec[2:3, :HIDDEN]
    bd = vec[3:4, :]
    h = jnp.dot(x_ref[...].astype(jnp.bfloat16), w1_ref[...],
                preferred_element_type=jnp.float32) + b1
    h = jax.nn.gelu(h)
    h = _layernorm(h, g, b)
    o_ref[...] = jnp.dot(h.astype(jnp.bfloat16), wd_ref[...],
                         preferred_element_type=jnp.float32) + bd


def mlm_head(x2d, params):
    M = x2d.shape[0]
    return pl.pallas_call(
        _mlm_head_kernel,
        out_shape=jax.ShapeDtypeStruct((M, LANE_PAD), jnp.float32),
    )(x2d, params["mlm_w"], params["dec_w"], params["head_vec"])


def _cls_head_kernel(x_ref, wp_ref, wc_ref, vec_ref, o_ref):
    """Pooler (tanh dense on CLS token) + classification head, fused."""
    vec = vec_ref[...]
    bp = vec[0:1, :HIDDEN]
    bc = vec[1:2, :]
    pooled = jnp.tanh(jnp.dot(x_ref[...].astype(jnp.bfloat16), wp_ref[...],
                              preferred_element_type=jnp.float32) + bp)
    o_ref[...] = jnp.dot(pooled.astype(jnp.bfloat16), wc_ref[...],
                         preferred_element_type=jnp.float32) + bc


def cls_head(cls_tok, params):
    B = cls_tok.shape[0]
    return pl.pallas_call(
        _cls_head_kernel,
        out_shape=jax.ShapeDtypeStruct((B, LANE_PAD), jnp.float32),
    )(cls_tok, params["pool_w"], params["cls_w"], params["cls_vec"])


# ---------------- parameter init (deterministic, synthetic) ----------------
def init_params(key):
    keys = iter(jax.random.split(key, 64))

    def nrm(shape, scale=0.02, dtype=jnp.bfloat16):
        return (scale * jax.random.normal(next(keys), shape, jnp.float32)).astype(dtype)

    def pad_to(w, n, axis):
        pad = [(0, 0)] * w.ndim
        pad[axis] = (0, n - w.shape[axis])
        return jnp.pad(w, pad)

    # stacked encoder weights (leading layer dim), bf16
    wqkv = nrm((N_LAYERS, HIDDEN, 3 * HIDDEN))
    wo = nrm((N_LAYERS, HIDDEN, HIDDEN))
    wi = nrm((N_LAYERS, HIDDEN, INTERMEDIATE))
    wo2 = nrm((N_LAYERS, INTERMEDIATE, HIDDEN))

    # packed per-layer small vectors, rows:
    # 0 bqkv | 1 bo | 2 ln1_g | 3 ln1_b | 4 bi | 5 bo2 | 6 ln2_g | 7 ln2_b
    vec = jnp.zeros((N_LAYERS, 8, LANE_PAD), jnp.float32)
    vec = vec.at[:, 2, :HIDDEN].set(1.0)
    vec = vec.at[:, 6, :HIDDEN].set(1.0)

    emb_vec = jnp.zeros((2, HIDDEN), jnp.float32).at[0].set(1.0)   # [gamma; beta]

    # MLM head vectors: 0 mlm_b | 1 mlm_ln_g | 2 mlm_ln_b | 3 dec_b(padded)
    head_vec = jnp.zeros((4, LANE_PAD), jnp.float32).at[1, :HIDDEN].set(1.0)
    # pooler/classifier vectors: 0 pool_b | 1 cls_b(padded)
    cls_vec = jnp.zeros((2, LANE_PAD), jnp.float32)

    return dict(
        word_emb=nrm((VOCAB, HIDDEN), dtype=jnp.float32),
        pos_emb=nrm((MAX_POS, HIDDEN), dtype=jnp.float32),
        type_emb=nrm((2, HIDDEN), dtype=jnp.float32),
        emb_vec=emb_vec,
        wqkv=wqkv, wo=wo, wi=wi, wo2=wo2, vec=vec,
        # head weights: in-dim padded to 128 rows (consume the lane-dense slab),
        # out-dim padded to 128 lanes (unmasked logit stores)
        # TODO(synk): HF BERT ties dec_w to word_emb; synthetic params keep them independent.
        mlm_w=pad_to(nrm((HIDDEN, HIDDEN)), LANE_PAD, 0),
        dec_w=pad_to(nrm((HIDDEN, VOCAB)), LANE_PAD, 1),
        head_vec=head_vec,
        pool_w=pad_to(nrm((HIDDEN, HIDDEN)), LANE_PAD, 0),
        cls_w=pad_to(nrm((HIDDEN, NUM_CLASSES)), LANE_PAD, 1),
        cls_vec=cls_vec,
    )


# ---------------- model (embedding gather is glue; everything else Pallas) ----
@functools.partial(jax.jit, static_argnames=("mode",))
def bertax_forward(params, input_ids, attention_mask=None, mode="pretrain"):
    B, S = input_ids.shape
    if attention_mask is None:
        attention_mask = jnp.ones((B, S), jnp.float32)

    # TODO(synk): embedding-table gather (word/pos/type lookup) stays in XLA glue.
    x = (params["word_emb"][input_ids]
         + params["pos_emb"][jnp.arange(S)][None, :, :]
         + params["type_emb"][0][None, None, :])            # (B, S, HIDDEN) f32

    # single additive mask, broadcast to heads inside the fused kernel
    add_mask3 = ((1.0 - attention_mask.astype(jnp.float32)) * -1e9).reshape(B, 1, S)

    seq_pad = encoder(x, add_mask3, params)                  # (B, S, 128) lane-dense

    if mode == "pretrain":
        logits = mlm_head(seq_pad.reshape(B * S, LANE_PAD), params)[:, :VOCAB]
        return logits.reshape(B, S, VOCAB)
    if mode == "classify":
        cls_tok = seq_pad[:, 0, :]                           # (B, 128) CLS token
        return cls_head(cls_tok, params)[:, :NUM_CLASSES]
    raise ValueError(f"Invalid mode: {mode}. Use 'pretrain' or 'classify'.")


# ---------------- demo ----------------
if __name__ == "__main__":
    key = jax.random.PRNGKey(0)
    k_param, k_ids = jax.random.split(key)
    params = init_params(k_param)

    B, S = 2, 8
    input_ids = jax.random.randint(k_ids, (B, S), 0, VOCAB, dtype=jnp.int32)
    attention_mask = jnp.ones((B, S), jnp.float32)

    # default ModularBertax mode is 'pretrain' -> MLM logits over the sequence
    mlm_logits = bertax_forward(params, input_ids, attention_mask, mode="pretrain")
    cls_logits = bertax_forward(params, input_ids, attention_mask, mode="classify")

    jax.block_until_ready(mlm_logits)
    jax.block_until_ready(cls_logits)

    assert mlm_logits.shape == (B, S, VOCAB)
    assert cls_logits.shape == (B, NUM_CLASSES)
    assert bool(jnp.all(jnp.isfinite(mlm_logits)))
    assert bool(jnp.all(jnp.isfinite(cls_logits)))
    print("KERNEL_OK")
</pallas_src>

<mosaic_0001>
module attributes {stable_mosaic.version = 11 : i64} {
  func.func @_mlm_head_kernel(%arg0: memref<16x128xf32, #tpu.memory_space<vmem>>, %arg1: memref<128x32xbf16, #tpu.memory_space<vmem>>, %arg2: memref<32x128xbf16, #tpu.memory_space<vmem>>, %arg3: memref<4x128xf32, #tpu.memory_space<vmem>>, %arg4: memref<16x128xf32, #tpu.memory_space<vmem>>) attributes {dimension_semantics = [], scalar_prefetch = 0 : i64, scratch_operands = 0 : i64, tpu.core_type = #tpu.core_type<tc>} {
    %c0 = arith.constant 0 : index
    %c0_0 = arith.constant 0 : index
    %0 = vector.load %arg3[%c0, %c0_0] : memref<4x128xf32, #tpu.memory_space<vmem>>, vector<4x128xf32>
    %1 = vector.extract_strided_slice %0 {offsets = [0, 0], sizes = [1, 32], strides = [1, 1]} : vector<4x128xf32> to vector<1x32xf32>
    %2 = vector.extract_strided_slice %0 {offsets = [1, 0], sizes = [1, 32], strides = [1, 1]} : vector<4x128xf32> to vector<1x32xf32>
    %3 = vector.extract_strided_slice %0 {offsets = [2, 0], sizes = [1, 32], strides = [1, 1]} : vector<4x128xf32> to vector<1x32xf32>
    %4 = vector.extract_strided_slice %0 {offsets = [3, 0], sizes = [1, 128], strides = [1, 1]} : vector<4x128xf32> to vector<1x128xf32>
    %c0_1 = arith.constant 0 : index
    %c0_2 = arith.constant 0 : index
    %5 = vector.load %arg0[%c0_1, %c0_2] : memref<16x128xf32, #tpu.memory_space<vmem>>, vector<16x128xf32>
    %6 = arith.truncf %5 : vector<16x128xf32> to vector<16x128xbf16>
    %c0_3 = arith.constant 0 : index
    %c0_4 = arith.constant 0 : index
    %7 = vector.load %arg1[%c0_3, %c0_4] : memref<128x32xbf16, #tpu.memory_space<vmem>>, vector<128x32xbf16>
    %cst = arith.constant dense<0.000000e+00> : vector<16x32xf32>
    %8 = tpu.matmul %6, %7, %cst {dimension_numbers = #tpu.dot_dimension_numbers<[1], [0], [0], [1], [0, 0, 1, 1], [], []>} : vector<16x128xbf16>, vector<128x32xbf16>, vector<16x32xf32> -> vector<16x32xf32>
    %9 = vector.broadcast %1 : vector<1x32xf32> to vector<16x32xf32>
    %10 = arith.addf %8, %9 : vector<16x32xf32>
    %11 = arith.mulf %10, %10 : vector<16x32xf32>
    %12 = arith.mulf %10, %11 : vector<16x32xf32>
    %cst_5 = arith.constant 4.471500e-02 : f32
    %13 = vector.broadcast %cst_5 : f32 to vector<16x32xf32>
    %14 = arith.mulf %13, %12 : vector<16x32xf32>
    %15 = arith.addf %10, %14 : vector<16x32xf32>
    %cst_6 = arith.constant 0.797884583 : f32
    %16 = vector.broadcast %cst_6 : f32 to vector<16x32xf32>
    %17 = arith.mulf %16, %15 : vector<16x32xf32>
    %18 = math.tanh %17 : vector<16x32xf32>
    %cst_7 = arith.constant 1.000000e+00 : f32
    %19 = vector.broadcast %cst_7 : f32 to vector<16x32xf32>
    %20 = arith.addf %19, %18 : vector<16x32xf32>
    %cst_8 = arith.constant 5.000000e-01 : f32
    %21 = vector.broadcast %cst_8 : f32 to vector<16x32xf32>
    %22 = arith.mulf %21, %20 : vector<16x32xf32>
    %23 = arith.mulf %10, %22 : vector<16x32xf32>
    %cst_9 = arith.constant dense<0.000000e+00> : vector<16xf32>
    %24 = vector.multi_reduction <add>, %23, %cst_9 [1] : vector<16x32xf32> to vector<16xf32>
    %25 = vector.shape_cast %24 : vector<16xf32> to vector<16x1xf32>
    %cst_10 = arith.constant 3.200000e+01 : f32
    %26 = vector.broadcast %cst_10 : f32 to vector<16x1xf32>
    %27 = arith.divf %25, %26 : vector<16x1xf32>
    %28 = vector.broadcast %27 : vector<16x1xf32> to vector<16x32xf32>
    %29 = arith.subf %23, %28 : vector<16x32xf32>
    %30 = arith.mulf %29, %29 : vector<16x32xf32>
    %cst_11 = arith.constant dense<0.000000e+00> : vector<16xf32>
    %31 = vector.multi_reduction <add>, %30, %cst_11 [1] : vector<16x32xf32> to vector<16xf32>
    %32 = vector.shape_cast %31 : vector<16xf32> to vector<16x1xf32>
    %cst_12 = arith.constant 3.200000e+01 : f32
    %33 = vector.broadcast %cst_12 : f32 to vector<16x1xf32>
    %34 = arith.divf %32, %33 : vector<16x1xf32>
    %cst_13 = arith.constant 9.99999996E-13 : f32
    %35 = vector.broadcast %cst_13 : f32 to vector<16x1xf32>
    %36 = arith.addf %34, %35 : vector<16x1xf32>
    %37 = math.rsqrt %36 : vector<16x1xf32>
    %38 = vector.broadcast %37 : vector<16x1xf32> to vector<16x32xf32>
    %39 = arith.mulf %29, %38 : vector<16x32xf32>
    %40 = vector.broadcast %2 : vector<1x32xf32> to vector<16x32xf32>
    %41 = arith.mulf %39, %40 : vector<16x32xf32>
    %42 = vector.broadcast %3 : vector<1x32xf32> to vector<16x32xf32>
    %43 = arith.addf %41, %42 : vector<16x32xf32>
    %44 = arith.truncf %43 : vector<16x32xf32> to vector<16x32xbf16>
    %c0_14 = arith.constant 0 : index
    %c0_15 = arith.constant 0 : index
    %45 = vector.load %arg2[%c0_14, %c0_15] : memref<32x128xbf16, #tpu.memory_space<vmem>>, vector<32x128xbf16>
    %cst_16 = arith.constant dense<0.000000e+00> : vector<16x128xf32>
    %46 = tpu.matmul %44, %45, %cst_16 {dimension_numbers = #tpu.dot_dimension_numbers<[1], [0], [0], [1], [0, 0, 1, 1], [], []>} : vector<16x32xbf16>, vector<32x128xbf16>, vector<16x128xf32> -> vector<16x128xf32>
    %47 = vector.broadcast %4 : vector<1x128xf32> to vector<16x128xf32>
    %48 = arith.addf %46, %47 : vector<16x128xf32>
    %c0_17 = arith.constant 0 : index
    %c0_18 = arith.constant 0 : index
    %49 = vector.load %arg4[%c0_17, %c0_18] : memref<16x128xf32, #tpu.memory_space<vmem>>, vector<16x128xf32>
    tpu.vector_store %arg4[%c0_17, %c0_18], %48 {strides = array<i32>} : memref<16x128xf32, #tpu.memory_space<vmem>>, vector<16x128xf32>,
    return
  }
}

module attributes {stable_mosaic.version = 11 : i64} {
  func.func @_encoder_kernel(%arg0: i32, %arg1: i32, %arg2: memref<1x8x32xf32, #tpu.memory_space<vmem>>, %arg3: memref<1x1x8xf32, #tpu.memory_space<vmem>>, %arg4: memref<2x32xf32, #tpu.memory_space<vmem>>, %arg5: memref<1x32x96xbf16, #tpu.memory_space<vmem>>, %arg6: memref<1x32x32xbf16, #tpu.memory_space<vmem>>, %arg7: memref<1x32x64xbf16, #tpu.memory_space<vmem>>, %arg8: memref<1x64x32xbf16, #tpu.memory_space<vmem>>, %arg9: memref<1x8x128xf32, #tpu.memory_space<vmem>>, %arg10: memref<1x8x128xf32, #tpu.memory_space<vmem>>, %arg11: memref<8x32xf32, #tpu.memory_space<vmem>>) attributes {dimension_semantics = [#tpu.dimension_semantics<parallel>, #tpu.dimension_semantics<arbitrary>], iteration_bounds = array<i64: 2, 2>, scalar_prefetch = 0 : i64, scratch_operands = 1 : i64, tpu.core_type = #tpu.core_type<tc>, window_params = [{transform_indices = @transform_0, window_bounds = array<i64: 1, 8, 32>}, {transform_indices = @transform_1, window_bounds = array<i64: 1, 1, 8>}, {pipeline_mode = #tpu.pipeline_mode<synchronous>, transform_indices = @transform_2, window_bounds = array<i64: 2, 32>}, {transform_indices = @transform_3, window_bounds = array<i64: 1, 32, 96>}, {transform_indices = @transform_4, window_bounds = array<i64: 1, 32, 32>}, {transform_indices = @transform_5, window_bounds = array<i64: 1, 32, 64>}, {transform_indices = @transform_6, window_bounds = array<i64: 1, 64, 32>}, {transform_indices = @transform_7, window_bounds = array<i64: 1, 8, 128>}, {transform_indices = @transform_8, window_bounds = array<i64: 1, 8, 128>}]} {
    %c0_i32 = arith.constant 0 : i32
    %0 = arith.cmpi eq, %arg1, %c0_i32 : i32
    %1 = arith.extui %0 : i1 to i32
    %c0_i32_0 = arith.constant 0 : i32
    %2 = arith.cmpi ne, %1, %c0_i32_0 : i32
    scf.if %2 {
      %c0_45 = arith.constant 0 : index
      %c0_46 = arith.constant 0 : index
      %131 = vector.load %arg4[%c0_45, %c0_46] : memref<2x32xf32, #tpu.memory_space<vmem>>, vector<2x32xf32>
      %c0_47 = arith.constant 0 : index
      %c0_48 = arith.constant 0 : index
      %c0_49 = arith.constant 0 : index
      %132 = vector.load %arg2[%c0_47, %c0_48, %c0_49] : memref<1x8x32xf32, #tpu.memory_space<vmem>>, vector<1x8x32xf32>
      %133 = vector.shape_cast %132 : vector<1x8x32xf32> to vector<8x32xf32>
      %134 = vector.extract_strided_slice %131 {offsets = [0, 0], sizes = [1, 32], strides = [1, 1]} : vector<2x32xf32> to vector<1x32xf32>
      %135 = vector.extract_strided_slice %131 {offsets = [1, 0], sizes = [1, 32], strides = [1, 1]} : vector<2x32xf32> to vector<1x32xf32>
      %cst_50 = arith.constant dense<0.000000e+00> : vector<8xf32>
      %136 = vector.multi_reduction <add>, %133, %cst_50 [1] : vector<8x32xf32> to vector<8xf32>
      %137 = vector.shape_cast %136 : vector<8xf32> to vector<8x1xf32>
      %cst_51 = arith.constant 3.200000e+01 : f32
      %138 = vector.broadcast %cst_51 : f32 to vector<8x1xf32>
      %139 = arith.divf %137, %138 : vector<8x1xf32>
      %140 = vector.broadcast %139 : vector<8x1xf32> to vector<8x32xf32>
      %141 = arith.subf %133, %140 : vector<8x32xf32>
      %142 = arith.mulf %141, %141 : vector<8x32xf32>
      %cst_52 = arith.constant dense<0.000000e+00> : vector<8xf32>
      %143 = vector.multi_reduction <add>, %142, %cst_52 [1] : vector<8x32xf32> to vector<8xf32>
      %144 = vector.shape_cast %143 : vector<8xf32> to vector<8x1xf32>
      %cst_53 = arith.constant 3.200000e+01 : f32
      %145 = vector.broadcast %cst_53 : f32 to vector<8x1xf32>
      %146 = arith.divf %144, %145 : vector<8x1xf32>
      %cst_54 = arith.constant 9.99999996E-13 : f32
      %147 = vector.broadcast %cst_54 : f32 to vector<8x1xf32>
      %148 = arith.addf %146, %147 : vector<8x1xf32>
      %149 = math.rsqrt %148 : vector<8x1xf32>
      %150 = vector.broadcast %149 : vector<8x1xf32> to vector<8x32xf32>
      %151 = arith.mulf %141, %150 : vector<8x32xf32>
      %152 = vector.broadcast %134 : vector<1x32xf32> to vector<8x32xf32>
      %153 = arith.mulf %151, %152 : vector<8x32xf32>
      %154 = vector.broadcast %135 : vector<1x32xf32> to vector<8x32xf32>
      %155 = arith.addf %153, %154 : vector<8x32xf32>
      %c0_55 = arith.constant 0 : index
      %c0_56 = arith.constant 0 : index
      %156 = vector.load %arg11[%c0_55, %c0_56] : memref<8x32xf32, #tpu.memory_space<vmem>>, vector<8x32xf32>
      tpu.vector_store %arg11[%c0_55, %c0_56], %155 {strides = array<i32>} : memref<8x32xf32, #tpu.memory_space<vmem>>, vector<8x32xf32>,
    } else {
    }
    %c0 = arith.constant 0 : index
    %c0_1 = arith.constant 0 : index
    %3 = vector.load %arg11[%c0, %c0_1] : memref<8x32xf32, #tpu.memory_space<vmem>>, vector<8x32xf32>
    %c0_2 = arith.constant 0 : index
    %c0_3 = arith.constant 0 : index
    %c0_4 = arith.constant 0 : index
    %4 = vector.load %arg9[%c0_2, %c0_3, %c0_4] : memref<1x8x128xf32, #tpu.memory_space<vmem>>, vector<1x8x128xf32>
    %5 = vector.shape_cast %4 : vector<1x8x128xf32> to vector<8x128xf32>
    %6 = vector.extract_strided_slice %5 {offsets = [0, 0], sizes = [1, 96], strides = [1, 1]} : vector<8x128xf32> to vector<1x96xf32>
    %7 = vector.extract_strided_slice %5 {offsets = [1, 0], sizes = [1, 32], strides = [1, 1]} : vector<8x128xf32> to vector<1x32xf32>
    %8 = vector.extract_strided_slice %5 {offsets = [2, 0], sizes = [1, 32], strides = [1, 1]} : vector<8x128xf32> to vector<1x32xf32>
    %9 = vector.extract_strided_slice %5 {offsets = [3, 0], sizes = [1, 32], strides = [1, 1]} : vector<8x128xf32> to vector<1x32xf32>
    %10 = vector.extract_strided_slice %5 {offsets = [4, 0], sizes = [1, 64], strides = [1, 1]} : vector<8x128xf32> to vector<1x64xf32>
    %11 = vector.extract_strided_slice %5 {offsets = [5, 0], sizes = [1, 32], strides = [1, 1]} : vector<8x128xf32> to vector<1x32xf32>
    %12 = vector.extract_strided_slice %5 {offsets = [6, 0], sizes = [1, 32], strides = [1, 1]} : vector<8x128xf32> to vector<1x32xf32>
    %13 = vector.extract_strided_slice %5 {offsets = [7, 0], sizes = [1, 32], strides = [1, 1]} : vector<8x128xf32> to vector<1x32xf32>
    %14 = arith.truncf %3 : vector<8x32xf32> to vector<8x32xbf16>
    %c0_5 = arith.constant 0 : index
    %c0_6 = arith.constant 0 : index
    %c0_7 = arith.constant 0 : index
    %15 = vector.load %arg5[%c0_5, %c0_6, %c0_7] : memref<1x32x96xbf16, #tpu.memory_space<vmem>>, vector<1x32x96xbf16>
    %16 = vector.shape_cast %15 : vector<1x32x96xbf16> to vector<32x96xbf16>
    %cst = arith.constant dense<0.000000e+00> : vector<8x96xf32>
    %17 = tpu.matmul %14, %16, %cst {dimension_numbers = #tpu.dot_dimension_numbers<[1], [0], [0], [1], [0, 0, 1, 1], [], []>} : vector<8x32xbf16>, vector<32x96xbf16>, vector<8x96xf32> -> vector<8x96xf32>
    %18 = vector.broadcast %6 : vector<1x96xf32> to vector<8x96xf32>
    %19 = arith.addf %17, %18 : vector<8x96xf32>
    %20 = vector.extract_strided_slice %19 {offsets = [0, 0], sizes = [8, 32], strides = [1, 1]} : vector<8x96xf32> to vector<8x32xf32>
    %cst_8 = arith.constant 2.500000e-01 : f32
    %21 = vector.broadcast %cst_8 : f32 to vector<8x32xf32>
    %22 = arith.mulf %20, %21 : vector<8x32xf32>
    %23 = vector.shape_cast %22 : vector<8x32xf32> to vector<8x2x16xf32>
    %24 = vector.extract_strided_slice %19 {offsets = [0, 32], sizes = [8, 32], strides = [1, 1]} : vector<8x96xf32> to vector<8x32xf32>
    %25 = vector.shape_cast %24 : vector<8x32xf32> to vector<8x2x16xf32>
    %26 = vector.extract_strided_slice %19 {offsets = [0, 64], sizes = [8, 32], strides = [1, 1]} : vector<8x96xf32> to vector<8x32xf32>
    %27 = vector.shape_cast %26 : vector<8x32xf32> to vector<8x2x16xf32>
    %28 = tpu.transpose %23, [1, 0, 2] : vector<8x2x16xf32> -> vector<2x8x16xf32>
    %29 = tpu.transpose %25, [1, 0, 2] : vector<8x2x16xf32> -> vector<2x8x16xf32>
    %30 = tpu.transpose %27, [1, 0, 2] : vector<8x2x16xf32> -> vector<2x8x16xf32>
    %31 = arith.truncf %28 : vector<2x8x16xf32> to vector<2x8x16xbf16>
    %32 = arith.truncf %29 : vector<2x8x16xf32> to vector<2x8x16xbf16>
    "tpu.trace_start"() <{level = 10 : i32, message = "hqd,hkd->hqk"}> : () -> ()
    %cst_9 = arith.constant dense<0.000000e+00> : vector<2x8x8xf32>
    %33 = tpu.matmul %31, %32, %cst_9 {dimension_numbers = #tpu.dot_dimension_numbers<[2], [2], [1], [1], [0, 0, 0, 1, 1, 1], [0], [0]>} : vector<2x8x16xbf16>, vector<2x8x16xbf16>, vector<2x8x8xf32> -> vector<2x8x8xf32>
    "tpu.trace_stop"() : () -> ()
    %c0_10 = arith.constant 0 : index
    %c0_11 = arith.constant 0 : index
    %c0_12 = arith.constant 0 : index
    %34 = vector.load %arg3[%c0_10, %c0_11, %c0_12] : memref<1x1x8xf32, #tpu.memory_space<vmem>>, vector<1x1x8xf32>
    %35 = vector.shape_cast %34 : vector<1x1x8xf32> to vector<1x8xf32>
    %36 = vector.shape_cast %35 : vector<1x8xf32> to vector<1x1x8xf32>
    %37 = vector.broadcast %36 : vector<1x1x8xf32> to vector<2x8x8xf32>
    %38 = arith.addf %33, %37 : vector<2x8x8xf32>
    %cst_13 = arith.constant dense<0xFF800000> : vector<2x8xf32>
    %39 = vector.multi_reduction <maximumf>, %38, %cst_13 [2] : vector<2x8x8xf32> to vector<2x8xf32>
    %40 = vector.shape_cast %39 : vector<2x8xf32> to vector<2x8x1xf32>
    %41 = vector.broadcast %40 : vector<2x8x1xf32> to vector<2x8x8xf32>
    %42 = arith.subf %38, %41 : vector<2x8x8xf32>
    %43 = math.exp %42 : vector<2x8x8xf32>
    %cst_14 = arith.constant dense<0.000000e+00> : vector<2x8xf32>
    %44 = vector.multi_reduction <add>, %43, %cst_14 [2] : vector<2x8x8xf32> to vector<2x8xf32>
    %45 = vector.shape_cast %44 : vector<2x8xf32> to vector<2x8x1xf32>
    %46 = tpu.reciprocal %45 {approx = true} : vector<2x8x1xf32> -> vector<2x8x1xf32>
    %47 = vector.broadcast %46 : vector<2x8x1xf32> to vector<2x8x8xf32>
    %48 = arith.mulf %43, %47 : vector<2x8x8xf32>
    %49 = arith.truncf %48 : vector<2x8x8xf32> to vector<2x8x8xbf16>
    %50 = arith.truncf %30 : vector<2x8x16xf32> to vector<2x8x16xbf16>
    "tpu.trace_start"() <{level = 10 : i32, message = "hqk,hkd->hqd"}> : () -> ()
    %cst_15 = arith.constant dense<0.000000e+00> : vector<2x8x16xf32>
    %51 = tpu.matmul %49, %50, %cst_15 {dimension_numbers = #tpu.dot_dimension_numbers<[2], [1], [1], [2], [0, 0, 0, 1, 1, 2], [0], [0]>} : vector<2x8x8xbf16>, vector<2x8x16xbf16>, vector<2x8x16xf32> -> vector<2x8x16xf32>
    "tpu.trace_stop"() : () -> ()
    %52 = tpu.transpose %51, [1, 0, 2] : vector<2x8x16xf32> -> vector<8x2x16xf32>
    %53 = vector.shape_cast %52 : vector<8x2x16xf32> to vector<8x32xf32>
    %54 = arith.truncf %53 : vector<8x32xf32> to vector<8x32xbf16>
    %c0_16 = arith.constant 0 : index
    %c0_17 = arith.constant 0 : index
    %c0_18 = arith.constant 0 : index
    %55 = vector.load %arg6[%c0_16, %c0_17, %c0_18] : memref<1x32x32xbf16, #tpu.memory_space<vmem>>, vector<1x32x32xbf16>
    %56 = vector.shape_cast %55 : vector<1x32x32xbf16> to vector<32x32xbf16>
    %cst_19 = arith.constant dense<0.000000e+00> : vector<8x32xf32>
    %57 = tpu.matmul %54, %56, %cst_19 {dimension_numbers = #tpu.dot_dimension_numbers<[1], [0], [0], [1], [0, 0, 1, 1], [], []>} : vector<8x32xbf16>, vector<32x32xbf16>, vector<8x32xf32> -> vector<8x32xf32>
    %58 = vector.broadcast %7 : vector<1x32xf32> to vector<8x32xf32>
    %59 = arith.addf %57, %58 : vector<8x32xf32>
    %60 = arith.addf %3, %59 : vector<8x32xf32>
    %cst_20 = arith.constant dense<0.000000e+00> : vector<8xf32>
    %61 = vector.multi_reduction <add>, %60, %cst_20 [1] : vector<8x32xf32> to vector<8xf32>
    %62 = vector.shape_cast %61 : vector<8xf32> to vector<8x1xf32>
    %cst_21 = arith.constant 3.200000e+01 : f32
    %63 = vector.broadcast %cst_21 : f32 to vector<8x1xf32>
    %64 = arith.divf %62, %63 : vector<8x1xf32>
    %65 = vector.broadcast %64 : vector<8x1xf32> to vector<8x32xf32>
    %66 = arith.subf %60, %65 : vector<8x32xf32>
    %67 = arith.mulf %66, %66 : vector<8x32xf32>
    %cst_22 = arith.constant dense<0.000000e+00> : vector<8xf32>
    %68 = vector.multi_reduction <add>, %67, %cst_22 [1] : vector<8x32xf32> to vector<8xf32>
    %69 = vector.shape_cast %68 : vector<8xf32> to vector<8x1xf32>
    %cst_23 = arith.constant 3.200000e+01 : f32
    %70 = vector.broadcast %cst_23 : f32 to vector<8x1xf32>
    %71 = arith.divf %69, %70 : vector<8x1xf32>
    %cst_24 = arith.constant 9.99999996E-13 : f32
    %72 = vector.broadcast %cst_24 : f32 to vector<8x1xf32>
    %73 = arith.addf %71, %72 : vector<8x1xf32>
    %74 = math.rsqrt %73 : vector<8x1xf32>
    %75 = vector.broadcast %74 : vector<8x1xf32> to vector<8x32xf32>
    %76 = arith.mulf %66, %75 : vector<8x32xf32>
    %77 = vector.broadcast %8 : vector<1x32xf32> to vector<8x32xf32>
    %78 = arith.mulf %76, %77 : vector<8x32xf32>
    %79 = vector.broadcast %9 : vector<1x32xf32> to vector<8x32xf32>
    %80 = arith.addf %78, %79 : vector<8x32xf32>
    %81 = arith.truncf %80 : vector<8x32xf32> to vector<8x32xbf16>
    %c0_25 = arith.constant 0 : index
    %c0_26 = arith.constant 0 : index
    %c0_27 = arith.constant 0 : index
    %82 = vector.load %arg7[%c0_25, %c0_26, %c0_27] : memref<1x32x64xbf16, #tpu.memory_space<vmem>>, vector<1x32x64xbf16>
    %83 = vector.shape_cast %82 : vector<1x32x64xbf16> to vector<32x64xbf16>
    %cst_28 = arith.constant dense<0.000000e+00> : vector<8x64xf32>
    %84 = tpu.matmul %81, %83, %cst_28 {dimension_numbers = #tpu.dot_dimension_numbers<[1], [0], [0], [1], [0, 0, 1, 1], [], []>} : vector<8x32xbf16>, vector<32x64xbf16>, vector<8x64xf32> -> vector<8x64xf32>
    %85 = vector.broadcast %10 : vector<1x64xf32> to vector<8x64xf32>
    %86 = arith.addf %84, %85 : vector<8x64xf32>
    %87 = arith.mulf %86, %86 : vector<8x64xf32>
    %88 = arith.mulf %86, %87 : vector<8x64xf32>
    %cst_29 = arith.constant 4.471500e-02 : f32
    %89 = vector.broadcast %cst_29 : f32 to vector<8x64xf32>
    %90 = arith.mulf %89, %88 : vector<8x64xf32>
    %91 = arith.addf %86, %90 : vector<8x64xf32>
    %cst_30 = arith.constant 0.797884583 : f32
    %92 = vector.broadcast %cst_30 : f32 to vector<8x64xf32>
    %93 = arith.mulf %92, %91 : vector<8x64xf32>
    %94 = math.tanh %93 : vector<8x64xf32>
    %cst_31 = arith.constant 1.000000e+00 : f32
    %95 = vector.broadcast %cst_31 : f32 to vector<8x64xf32>
    %96 = arith.addf %95, %94 : vector<8x64xf32>
    %cst_32 = arith.constant 5.000000e-01 : f32
    %97 = vector.broadcast %cst_32 : f32 to vector<8x64xf32>
    %98 = arith.mulf %97, %96 : vector<8x64xf32>
    %99 = arith.mulf %86, %98 : vector<8x64xf32>
    %100 = arith.truncf %99 : vector<8x64xf32> to vector<8x64xbf16>
    %c0_33 = arith.constant 0 : index
    %c0_34 = arith.constant 0 : index
    %c0_35 = arith.constant 0 : index
    %101 = vector.load %arg8[%c0_33, %c0_34, %c0_35] : memref<1x64x32xbf16, #tpu.memory_space<vmem>>, vector<1x64x32xbf16>
    %102 = vector.shape_cast %101 : vector<1x64x32xbf16> to vector<64x32xbf16>
    %cst_36 = arith.constant dense<0.000000e+00> : vector<8x32xf32>
    %103 = tpu.matmul %100, %102, %cst_36 {dimension_numbers = #tpu.dot_dimension_numbers<[1], [0], [0], [1], [0, 0, 1, 1], [], []>} : vector<8x64xbf16>, vector<64x32xbf16>, vector<8x32xf32> -> vector<8x32xf32>
    %104 = vector.broadcast %11 : vector<1x32xf32> to vector<8x32xf32>
    %105 = arith.addf %103, %104 : vector<8x32xf32>
    %106 = arith.addf %80, %105 : vector<8x32xf32>
    %cst_37 = arith.constant dense<0.000000e+00> : vector<8xf32>
    %107 = vector.multi_reduction <add>, %106, %cst_37 [1] : vector<8x32xf32> to vector<8xf32>
    %108 = vector.shape_cast %107 : vector<8xf32> to vector<8x1xf32>
    %cst_38 = arith.constant 3.200000e+01 : f32
    %109 = vector.broadcast %cst_38 : f32 to vector<8x1xf32>
    %110 = arith.divf %108, %109 : vector<8x1xf32>
    %111 = vector.broadcast %110 : vector<8x1xf32> to vector<8x32xf32>
    %112 = arith.subf %106, %111 : vector<8x32xf32>
    %113 = arith.mulf %112, %112 : vector<8x32xf32>
    %cst_39 = arith.constant dense<0.000000e+00> : vector<8xf32>
    %114 = vector.multi_reduction <add>, %113, %cst_39 [1] : vector<8x32xf32> to vector<8xf32>
    %115 = vector.shape_cast %114 : vector<8xf32> to vector<8x1xf32>
    %cst_40 = arith.constant 3.200000e+01 : f32
    %116 = vector.broadcast %cst_40 : f32 to vector<8x1xf32>
    %117 = arith.divf %115, %116 : vector<8x1xf32>
    %cst_41 = arith.constant 9.99999996E-13 : f32
    %118 = vector.broadcast %cst_41 : f32 to vector<8x1xf32>
    %119 = arith.addf %117, %118 : vector<8x1xf32>
    %120 = math.rsqrt %119 : vector<8x1xf32>
    %121 = vector.broadcast %120 : vector<8x1xf32> to vector<8x32xf32>
    %122 = arith.mulf %112, %121 : vector<8x32xf32>
    %123 = vector.broadcast %12 : vector<1x32xf32> to vector<8x32xf32>
    %124 = arith.mulf %122, %123 : vector<8x32xf32>
    %125 = vector.broadcast %13 : vector<1x32xf32> to vector<8x32xf32>
    %126 = arith.addf %124, %125 : vector<8x32xf32>
    %c0_42 = arith.constant 0 : index
    %c0_43 = arith.constant 0 : index
    %127 = vector.load %arg11[%c0_42, %c0_43] : memref<8x32xf32, #tpu.memory_space<vmem>>, vector<8x32xf32>
    tpu.vector_store %arg11[%c0_42, %c0_43], %126 {strides = array<i32>} : memref<8x32xf32, #tpu.memory_space<vmem>>, vector<8x32xf32>,
    %c1_i32 = arith.constant 1 : i32
    %128 = arith.cmpi eq, %arg1, %c1_i32 : i32
    %129 = arith.extui %128 : i1 to i32
    %c0_i32_44 = arith.constant 0 : i32
    %130 = arith.cmpi ne, %129, %c0_i32_44 : i32
    scf.if %130 {
      %cst_45 = arith.constant 0.000000e+00 : f32
      %131 = vector.broadcast %cst_45 : f32 to vector<8x96xf32>
      %132 = tpu.concatenate %126, %131 in 1 : vector<8x32xf32>, vector<8x96xf32> -> vector<8x128xf32>
      %c0_46 = arith.constant 0 : index
      %c0_47 = arith.constant 0 : index
      %c0_48 = arith.constant 0 : index
      %133 = vector.load %arg10[%c0_46, %c0_47, %c0_48] : memref<1x8x128xf32, #tpu.memory_space<vmem>>, vector<1x8x128xf32>
      %134 = vector.shape_cast %133 : vector<1x8x128xf32> to vector<8x128xf32>
      %135 = vector.shape_cast %132 : vector<8x128xf32> to vector<1x8x128xf32>
      tpu.vector_store %arg10[%c0_46, %c0_47, %c0_48], %135 {strides = array<i32>} : memref<1x8x128xf32, #tpu.memory_space<vmem>>, vector<1x8x128xf32>,
    } else {
    }
    return
  }
  func.func @transform_0(%arg0: i32, %arg1: i32) -> (i32, i32, i32) {
    %c0_i32 = arith.constant 0 : i32
    %c0_i32_0 = arith.constant 0 : i32
    %c0_i32_1 = arith.constant 0 : i32
    return %arg0, %c0_i32, %c0_i32_0 : i32, i32, i32
  }
  func.func @transform_1(%arg0: i32, %arg1: i32) -> (i32, i32, i32) {
    %c0_i32 = arith.constant 0 : i32
    %c0_i32_0 = arith.constant 0 : i32
    %c0_i32_1 = arith.constant 0 : i32
    return %arg0, %c0_i32, %c0_i32_0 : i32, i32, i32
  }
  func.func @transform_2(%arg0: i32, %arg1: i32) -> (i32, i32) {
    %c0_i32 = arith.constant 0 : i32
    %c0_i32_0 = arith.constant 0 : i32
    %c0_i32_1 = arith.constant 0 : i32
    return %c0_i32, %c0_i32_0 : i32, i32
  }
  func.func @transform_3(%arg0: i32, %arg1: i32) -> (i32, i32, i32) {
    %c0_i32 = arith.constant 0 : i32
    %c0_i32_0 = arith.constant 0 : i32
    %c0_i32_1 = arith.constant 0 : i32
    return %arg1, %c0_i32, %c0_i32_0 : i32, i32, i32
  }
  func.func @transform_4(%arg0: i32, %arg1: i32) -> (i32, i32, i32) {
    %c0_i32 = arith.constant 0 : i32
    %c0_i32_0 = arith.constant 0 : i32
    %c0_i32_1 = arith.constant 0 : i32
    return %arg1, %c0_i32, %c0_i32_0 : i32, i32, i32
  }
  func.func @transform_5(%arg0: i32, %arg1: i32) -> (i32, i32, i32) {
    %c0_i32 = arith.constant 0 : i32
    %c0_i32_0 = arith.constant 0 : i32
    %c0_i32_1 = arith.constant 0 : i32
    return %arg1, %c0_i32, %c0_i32_0 : i32, i32, i32
  }
  func.func @transform_6(%arg0: i32, %arg1: i32) -> (i32, i32, i32) {
    %c0_i32 = arith.constant 0 : i32
    %c0_i32_0 = arith.constant 0 : i32
    %c0_i32_1 = arith.constant 0 : i32
    return %arg1, %c0_i32, %c0_i32_0 : i32, i32, i32
  }
  func.func @transform_7(%arg0: i32, %arg1: i32) -> (i32, i32, i32) {
    %c0_i32 = arith.constant 0 : i32
    %c0_i32_0 = arith.constant 0 : i32
    %c0_i32_1 = arith.constant 0 : i32
    return %arg1, %c0_i32, %c0_i32_0 : i32, i32, i32
  }
  func.func @transform_8(%arg0: i32, %arg1: i32) -> (i32, i32, i32) {
    %c0_i32 = arith.constant 0 : i32
    %c0_i32_0 = arith.constant 0 : i32
    %c0_i32_1 = arith.constant 0 : i32
    return %arg0, %c0_i32, %c0_i32_0 : i32, i32, i32
  }
}

</mosaic_0001>

<bundles_post_ra>
// kernel: bertax_forward.3
= control target key start
LH: loop header
LB: loop body
LE: loop exit
PB: predicated region body
PF: predicated region fallthrough
CT: control target
= control target key end

     0   :  { %v331_v0 = vmov 0.0   ;;  %vm332_vm0 = vmmov 0   ;;  %v38_v12 = vlaneseq  ;;  %vm149_vm1 = vcmask 261120   ;;  %s432_s1 = inlined_call_operand.vmem [shape: bf16[128,32], index: 1, kind: input, shape index: {}]   ;;  %s433_s0 = inlined_call_operand.vmem [shape: f32[16,128], index: 0, kind: input, shape index: {}]   ;;  %s434_s3 = inlined_call_operand.vmem [shape: f32[4,128], index: 3, kind: input, shape index: {}]   ;;  %s435_s2 = inlined_call_operand.vmem [shape: bf16[32,128], index: 2, kind: input, shape index: {}]   ;;  %s436_s4 = inlined_call_operand.vmem [shape: f32[16,128], index: 4, kind: output, shape index: {}]  }
   0x1   :  { %283 = vmatprep.subr.bf16.mxu0 %v331_v0  ;;  %v313_v1 = vld [vmem:[%s432_s1] sm:$0xff]   ;;  %299 = vmatprep.mubr.msk.bf16.mxu0 %vm332_vm0, %v331_v0  ;;  %v314_v2 = vld [vmem:[%s432_s1 + $0x8] sm:$0xff]   ;;  %v315_v3 = vld [vmem:[%s432_s1 + $0x10] sm:$0xff]  }
   0x2   :  { %303 = vmatprep.subr.bf16.mxu1 %v331_v0  ;;  %307 = vmatprep.mubr.msk.bf16.mxu1 %vm332_vm0, %v331_v0  ;;  %v316_v4 = vld [vmem:[%s432_s1 + $0x18] sm:$0xff]   ;;  %v317_v5 = vld [vmem:[%s432_s1 + $0x20] sm:$0xff]   ;;  %v318_v6 = vld [vmem:[%s432_s1 + $0x28] sm:$0xff]   ;;  %v399_v13 = vshrl.u32 %v38_v12, 7 }
   0x3   :  { %284 = vmatpush3.bf16.msra.mxu0 %v313_v1  ;;  %v319_v7 = vld [vmem:[%s432_s1 + $0x30] sm:$0xff]   ;;  %v320_v8 = vld [vmem:[%s432_s1 + $0x38] sm:$0xff]   ;;  %v19_v9 = vld [vmem:[%s433_s0] sm:$0xff] }
   0x4   :  { %285 = vmatprep.subr.bf16.mxu0 %v331_v0  ;;  %v20_v10 = vld [vmem:[%s433_s0 + $0x8] sm:$0xff]  ;;  %v40_v14 = vsub.s32 0, %v399_v13  ;;  %v405_v15 = vld [vmem:[%s434_s3] sm:$0xf]  ;;  %v179_v61 = vsub.s32 1, %v399_v13  ;;  %v185_v1 = vsub.s32 2, %v399_v13 }
   0x5   :  { %v21_v11 = vpack.c.bf16 %v20_v10, %v19_v9  ;;  %v321_v53 = vld [vmem:[%s435_s2] sm:$0xff]   ;;  %v322_v54 = vld [vmem:[%s435_s2 + $0x8] sm:$0xff]   ;;  %v196_v10 = vsub.s32 3, %v399_v13 }
   0x6   :  { %v41_v16 = vrot.slane %v405_v15, %v40_v14  ;;  %304 = vmatpush3.bf16.msra.mxu1 %v321_v53  ;;  %v180_v63 = vrot.slane %v405_v15, %v179_v61 }
   0x7   :  { %286 = vmatpush3.bf16.msra.mxu0 %v314_v2  ;;  %305 = vmatprep.subr.bf16.mxu1 %v331_v0 }
   0x8   :  { %287 = vmatprep.subr.bf16.mxu0 %v331_v0 }
   0xa   :  { %306 = vmatpush3.bf16.msra.mxu1 %v322_v54 }
   0xb   :  { %288 = vmatpush3.bf16.msra.mxu0 %v315_v3 }
   0xc   :  { %289 = vmatprep.subr.bf16.mxu0 %v331_v0 }
   0xf   :  { %290 = vmatpush3.bf16.msra.mxu0 %v316_v4 }
  0x10   :  { %291 = vmatprep.subr.bf16.mxu0 %v331_v0 }
  0x13   :  { %292 = vmatpush3.bf16.msra.mxu0 %v317_v5 }
  0x14   :  { %293 = vmatprep.subr.bf16.mxu0 %v331_v0 }
  0x17   :  { %294 = vmatpush3.bf16.msra.mxu0 %v318_v6 }
  0x18   :  { %295 = vmatprep.subr.bf16.mxu0 %v331_v0 }
  0x1b   :  { %296 = vmatpush3.bf16.msra.mxu0 %v319_v7 }
  0x1c   :  { %297 = vmatprep.subr.bf16.mxu0 %v331_v0  ;;  %v186_v0 = vrot.slane %v405_v15, %v185_v1 }
  0x1f   :  { %298 = vmatpush3.bf16.msra.mxu0 %v320_v8 }
  0x22   :  { %300 = vmatmul.mubr.bf16.vlgmr.msra.gmra.mrb[0].mxu0 %v21_v11  ;;  %v197_v11 = vrot.slane %v405_v15, %v196_v10 }
  0xf5   :  { %v124_v17 = vpop.f32.mrb[0].mxu0 }
  0xf6   :  { %v125_v18 = vadd.f32 %v124_v17, %v41_v16  ;;  %v301_v19 = vpop.f32.mrb[1].mxu0 }
  0xf7   :  { %v127_v20 = vpop.f32.mrb[2].mxu0 }
  0xf8   :  { %v131_v21 = vmul.f32 %v125_v18, %v125_v18  ;;  %v128_v22 = vadd.f32 %v127_v20, %v41_v16  ;;  %v302_v23 = vpop.f32.mrb[3].mxu0 }
  0xfa   :  { %v133_v24 = vmul.f32 %v131_v21, %v125_v18  ;;  %v132_v25 = vmul.f32 %v128_v22, %v128_v22 }
  0xfc   :  { %v135_v26 = vmul.f32 0.044715, %v133_v24  ;;  %v134_v27 = vmul.f32 %v132_v25, %v128_v22 }
  0xfe   :  { %v136_v28 = vmul.f32 0.044715, %v134_v27  ;;  %v137_v29 = vadd.f32 %v135_v26, %v125_v18 }
 0x100   :  { %v138_v30 = vadd.f32 %v136_v28, %v128_v22  ;;  %v139_v31 = vmul.f32 0.7978846, %v137_v29 }
 0x102   :  { %323 = vtanh.f32 %v139_v31  ;;  %v140_v32 = vmul.f32 0.7978846, %v138_v30 }
 0x104   :  { %325 = vtanh.f32 %v140_v32 }
 0x10c   :  { %v324_v33 = vpop.eup %323 }
 0x10d   :  { %v143_v34 = vadd.f32 1.0, %v324_v33 }
 0x10e   :  { %v326_v35 = vpop.eup %325 }
 0x10f   :  { %v145_v36 = vmul.f32 0.5, %v143_v34  ;;  %v144_v37 = vadd.f32 1.0, %v326_v35 }
 0x111   :  { %v147_v38 = vmul.f32 %v145_v36, %v125_v18  ;;  %v146_v39 = vmul.f32 0.5, %v144_v37 }
 0x113   :  { %v150_v40 = vsel %vm149_vm1, %v147_v38, 0.0  ;;  %v148_v41 = vmul.f32 %v146_v39, %v128_v22 }
 0x114   :  { %151 = vadd.xlane.f32.xlu0 %v150_v40 }
 0x115   :  { %v153_v42 = vsel %vm149_vm1, %v148_v41, 0.0 }
 0x118   :  { %154 = vadd.xlane.f32.xlu0 %v153_v42 }
 0x1a1   :  { %v152_v43 = vpop.xlane.xlu0 %151 }
 0x1a2   :  { %v157_v44 = vmul.f32 0.03125, %v152_v43 }
 0x1a4   :  { %v159_v45 = vsub.f32 %v147_v38, %v157_v44 }
 0x1a5   :  { %v155_v46 = vpop.xlane.xlu0 %154 }
 0x1a6   :  { %v158_v47 = vmul.f32 0.03125, %v155_v46  ;;  %v161_v48 = vmul.f32 %v159_v45, %v159_v45 }
 0x1a8   :  { %v160_v49 = vsub.f32 %v148_v41, %v158_v47  ;;  %v163_v50 = vsel %vm149_vm1, %v161_v48, 0.0 }
 0x1a9   :  { %164 = vadd.xlane.f32.xlu1 %v163_v50 }
 0x1aa   :  { %v162_v51 = vmul.f32 %v160_v49, %v160_v49 }
 0x1ac   :  { %v166_v52 = vsel %vm149_vm1, %v162_v51, 0.0 }
 0x1ad   :  { %167 = vadd.xlane.f32.xlu1 %v166_v52 }
 0x236   :  { %v165_v55 = vpop.xlane.xlu1 %164 }
 0x237   :  { %v169_v56 = vmul.f32 0.03125, %v165_v55 }
 0x239   :  { %v171_v57 = vadd.f32 1e-12, %v169_v56 }
 0x23a   :  { %v168_v58 = vpop.xlane.xlu1 %167 }
 0x23b   :  { %327 = vrsqrt.f32 %v171_v57  ;;  %v170_v59 = vmul.f32 0.03125, %v168_v58 }
 0x23d   :  { %v172_v60 = vadd.f32 1e-12, %v170_v59 }
 0x23f   :  { %329 = vrsqrt.f32 %v172_v60 }
 0x245   :  { %v328_v62 = vpop.eup %327 }
 0x246   :  { %v175_v2 = vmul.f32 %v328_v62, %v159_v45 }
 0x248   :  { %v181_v5 = vmul.f32 %v180_v63, %v175_v2 }
 0x249   :  { %v330_v3 = vpop.eup %329 }
 0x24a   :  { %v176_v4 = vmul.f32 %v330_v3, %v160_v49  ;;  %v187_v7 = vadd.f32 %v186_v0, %v181_v5 }
 0x24c   :  { %v182_v6 = vmul.f32 %v180_v63, %v176_v4 }
 0x24e   :  { %v188_v8 = vadd.f32 %v186_v0, %v182_v6 }
 0x250   :  { %v189_v9 = vpack.c.bf16 %v188_v8, %v187_v7 }
 0x252   :  { %308 = vmatmul.mubr.msk.bf16.vlgmr.msra.gmra.mrb[0].mxu1 %vm149_vm1, %v189_v9 }
 0x325   :  { %v247_v12 = vpop.f32.mrb[0].mxu1 }
 0x326   :  { %v248_v14 = vadd.f32 %v247_v12, %v197_v11  ;;  %v309_v16 = vpop.f32.mrb[1].mxu1 }
 0x327   :  { %v250_v17 = vpop.f32.mrb[2].mxu1 }
 0x328   :  { %254 = vst [vmem:[%s436_s4] sm:$0xff] %v248_v14  ;;  %v251_v18 = vadd.f32 %v250_v17, %v197_v11  ;;  %v310_v19 = vpop.f32.mrb[3].mxu1 }
 0x32a   :  { %255 = vst [vmem:[%s436_s4 + $0x8] sm:$0xff] %v251_v18 }

// kernel: bertax_forward.2
= control target key start
LH: loop header
LB: loop body
LE: loop exit
PB: predicated region body
PF: predicated region fallthrough
CT: control target
= control target key end

     0   :  { %s1944_s27 = smov 0   ;;  %s1946_s28 = smov 0   ;;  %s2213_s0 = inlined_call_operand.vmem [shape: f32[2,8,32], index: 0, kind: input, shape index: {}]   ;;  %s2214_s1 = inlined_call_operand.vmem [shape: f32[2,1,8], index: 1, kind: input, shape index: {}]   ;;  %s2215_s2 = inlined_call_operand.vmem [shape: f32[2,32], index: 2, kind: input, shape index: {}]   ;;  %s2216_s3 = inlined_call_operand.vmem [shape: bf16[2,32,96], index: 3, kind: input, shape index: {}]   ;;  %s2217_s4 = inlined_call_operand.vmem [shape: bf16[2,32,32], index: 4, kind: input, shape index: {}]   ;;  %s2218_s5 = inlined_call_operand.vmem [shape: bf16[2,32,64], index: 5, kind: input, shape index: {}]   ;;  %s2219_s6 = inlined_call_operand.vmem [shape: bf16[2,64,32], index: 6, kind: input, shape index: {}]   ;;  %s2220_s7 = inlined_call_operand.vmem [shape: f32[2,8,128], index: 7, kind: input, shape index: {}]   ;;  %s2221_s8 = inlined_call_operand.vmem [shape: f32[2,8,128], index: 8, kind: output, shape index: {}]  }
   0x1   :  { %2222 = sst [smem:[#allocation5_spill]] %s2213_s0  ;;  %s1948_s29 = smov 0  }
   0x2   :  { %2223 = sst [smem:[#allocation6_spill]] %s2216_s3  ;;  %s1950_s30 = smov 0  }
   0x3   :  { %2224 = sst [smem:[#allocation7_spill]] %s2217_s4  ;;  %s1952_s9 = smov 0  }
   0x4 LB: > { %s27_s10 = sadd.s32 1, %s1881_s29  ;;  %s30_s11 = sadd.s32 1, %s1885_s30  ;;  %s1889_s9 = sphi %s1952_s9, %s18_s9   ;;  %s1885_s30 = sphi %s1950_s30, %s2236_s30   ;;  %s1881_s29 = sphi %s1948_s29, %s2235_s29   ;;  %s1877_s28 = sphi %s1946_s28, %s2234_s28   ;;  %s1873_s27 = sphi %s1944_s27, %s2233_s27  }
   0x5   : > { %p28_p0 = scmp.ge.s32.totalorder %s27_s10, 2  ;;  %p1648_p1 = scmp.ge.s32.totalorder %s1889_s9, 1 }
   0x6   : > { %p330_p2 = scmp.lt.s32.totalorder %s1889_s9, 5 }
   0x7   : > { %s2238_s10 = smov (%p28_p0, %s27_s10), 0  ;;  %s2240_s11 = smov (!%p28_p0, %s30_s11), %s1885_s30 }
   0x8   : > { %2225 = sst [smem:[#allocation3_spill]] %s2238_s10  ;;  %p331_p3 = pnand %p1648_p1, %p330_p2 }
   0x9   : > { %p32_p4 = scmp.ge.s32.totalorder %s2240_s11, 2  ;;  %p389_p5 = scmp.lt.s32.totalorder (!%p331_p3), %s1877_s28, 1 }
   0xa   : > { %334 = sbr.rel (%p331_p3) target bundleno = 3017 (0xbc9), region = 52  ;;  %p396_p6 = scmp.lt.s32.totalorder (!%p331_p3), %s1873_s27, 1 }
   0xb   : > { %s2242_s11 = smov (%p32_p4, %s2240_s11), 0  ;;  %s2227_s0 = sld [smem:[#allocation5_spill]] (!%p331_p3) }
   0xc   : > { %2226 = sst [smem:[#allocation4_spill]] %s2242_s11  ;;  %s2228_s3 = sld [smem:[#allocation6_spill]] (!%p331_p3) }
   0xd   : > { %s2229_s4 = sld [smem:[#allocation7_spill]] (!%p331_p3)  ;;  %p1660_p7 = scmp.ne.s32.totalorder (!%p331_p3), %s1873_s27, 0 }
  0x11   : > { %s2244_s28 = smov (!%p389_p5, %s1877_s28), 1  ;;  %vm431_vm0 = vcmask (!%p1660_p7), 261120   ;;  %v446_v9 = vlaneseq (!%p1660_p7)  ;;  %v429_v13 = vld [vmem:[%s2215_s2] sm:$0x3] (!%p1660_p7) }
  0x12   : > { %s397_s12 = scalar_select %p396_p6, %s1873_s27, 1 }
  0x13   : > { %s1649_s13 = sshll.u32 %s2244_s28, 3  ;;  %428 = sbr.rel (%p1660_p7) target bundleno = 336 (0x150), region = 56  ;;  %v447_v11 = vshrl.u32 (!%p1660_p7), %v446_v9, 7 }
  0x14   : > { %s392_s19 = scalar_lea.vmem %s2227_s0, %s1649_s13  ;;  %s1691_s20 = sshll.u32 %s397_s12, 4 }
  0x15   : > { %s1991_s23 = scalar_lea.vmem %s2228_s3, %s1691_s20  ;;  %s1996_s26 = scalar_lea.vmem %s2229_s4, %s1691_s20  ;;  %v430_v0 = vld [vmem:[%s392_s19] sm:$0xff] (!%p1660_p7)  ;;  %v448_v12 = vsub.s32 (!%p1660_p7), 0, %v447_v11  ;;  %v453_v14 = vsub.s32 (!%p1660_p7), 1, %v447_v11 }
  0x16   : > { %s2001_s14 = scalar_lea.vmem %s2218_s5, %s1691_s20  ;;  %s1694_s15 = sshll.u32 %s397_s12, 5  ;;  %v432_v1 = vsel (!%p1660_p7), %vm431_vm0, %v430_v0, 0.0 }
  0x17   : > { %s2006_s18 = scalar_lea.vmem %s2219_s6, %s1694_s15  ;;  %s1658_s0 = sshll.u32 %s397_s12, 3  ;;  %433 = vadd.xlane.f32.xlu0 (!%p1660_p7), %v432_v1  ;;  %v449_v15 = vrot.slane (!%p1660_p7), %v429_v13, %v448_v12  ;;  %v454_v18 = vrot.slane (!%p1660_p7), %v429_v13, %v453_v14 }
  0x18   : > { %s2011_s3 = scalar_lea.vmem %s2220_s7, %s1658_s0  ;;  %s2016_s4 = scalar_lea.vmem %s2221_s8, %s1649_s13 }
  0xa4   : > { %v434_v2 = vpop.xlane.xlu0 %433 }
  0xa5   : > { %v436_v3 = vmul.f32 0.03125, %v434_v2 }
  0xa7   : > { %v437_v4 = vsub.f32 %v430_v0, %v436_v3 }
  0xa9   : > { %v438_v5 = vmul.f32 %v437_v4, %v437_v4 }
  0xab   : > { %v439_v6 = vsel %vm431_vm0, %v438_v5, 0.0 }
  0xac   : > { %440 = vadd.xlane.f32.xlu0 %v439_v6 }
 0x139   : > { %v441_v7 = vpop.xlane.xlu0 %440 }
 0x13a   : > { %v442_v8 = vmul.f32 0.03125, %v441_v7 }
 0x13c   : > { %v443_v10 = vadd.f32 1e-12, %v442_v8 }
 0x13e   : > { %1825 = vrsqrt.f32 %v443_v10 }
 0x148   : > { %v1826_v16 = vpop.eup %1825 }
 0x149   : > { %v445_v17 = vmul.f32 %v1826_v16, %v437_v4 }
 0x14b   : > { %v450_v19 = vmul.f32 %v449_v15, %v445_v17 }
 0x14d   : > { %v455_v20 = vadd.f32 %v454_v18, %v450_v19 }
 0x14f   : > { %456 = vst.msk [vmem:[#allocation2] sm:$0xff] %vm431_vm0, %v455_v20 }
 0x150 PF: > { %v1827_v21 = vld [vmem:[%s1991_s23] sm:$0xff]   ;;  %v1891_v22 = vmov 0.0   ;;  %v1828_v23 = vld [vmem:[%s1991_s23 + $0x8] sm:$0xff]   ;;  %vm1892_vm1 = vmmov 0   ;;  %vm480_vm2 = vcmask 261120   ;;  %v464_v26 = vlaneseq  ;;  %s1893_s11 = smov 112   ;;  %s2230_s16 = scalar_lea.vmem %s2214_s1, %s2244_s28 }
 0x151   : > { %1717 = vmatprep.subr.bf16.mxu0 %v1891_v22  ;;  %1725 = vmatprep.subr.bf16.mxu1 %v1891_v22  ;;  %v2046_v29 = vld [vmem:[%s2011_s3] sm:$0xff]  ;;  %s1894_s12 = smov 96   ;;  %v1895_v38 = vmov 1983009808   ;;  %v1896_v40 = vmov 1934713408  }
 0x152   : > { %1718 = vmatpush3.bf16.msra.mxu0 %v1827_v21  ;;  %1721 = vmatprep.mubr.msk.bf16.mxu0 %vm1892_vm1, %v1891_v22  ;;  %v2042_v27 = vshrl.u32 %v464_v26, 7  ;;  %v531_v39 = vunpack.c.l.s4 %v1895_v38  ;;  %v562_v41 = vunpack.c.l.s4 %v1896_v40  ;;  %vm903_vm3 = vcmask 130048   ;;  %s1897_s19 = smov 64   ;;  %s1898_s28 = smov 16  }
 0x153   : > { %1719 = vmatprep.subr.bf16.mxu0 %v1891_v22  ;;  %1727 = vmatprep.mubr.msk.bf16.mxu1 %vm1892_vm1, %v1891_v22  ;;  %vm996_vm4 = vcmask 64512   ;;  %vm1026_vm5 = vcmask 1043456   ;;  %vm1436_vm6 = vcmask 523264   ;;  %p1688_p8 = scmp.ne.s32.totalorder %s1873_s27, 1 }
 0x154   : > { %v466_v28 = vsub.s32 0, %v2042_v27  ;;  %v532_v42 = vunpack.c.0.s8 %v531_v39  ;;  %v563_v44 = vunpack.c.0.s8 %v562_v41 }
 0x156   : > { %v2031_v24 = vld [vmem:[#allocation2] sm:$0xff]  ;;  %1720 = vmatpush3.bf16.msra.mxu0 %v1828_v23  ;;  %v467_v30 = vrot.slane %v2046_v29, %v466_v28  ;;  %v2058_v45 = vsub.s32 %v532_v42, %v2042_v27  ;;  %v2062_v48 = vsub.s32 %v563_v44, %v2042_v27 }
 0x157   : > { %v459_v25 = vpack.c.bf16 %v2031_v24, %v2031_v24  ;;  %1731 = vmatprep.subr.bf16.mxu0 %v1891_v22 }
 0x159   : > { %1722 = vmatmul.mubr.msk.bf16.vlgmr.msra.gmra.mrb[0].mxu0 %vm480_vm2, %v459_v25 }
 0x15a   : > { %1733 = vmatprep.mubr.msk.bf16.mxu0 %vm1892_vm1, %v1891_v22 }
 0x22c   : > { %v518_v31 = vpop.f32.mrb[0].mxu0 }
 0x22d   : > { %v2049_v32 = vadd.f32 %v518_v31, %v467_v30  ;;  %v1723_v33 = vpop.f32.mrb[1].mxu0 }
 0x22e   : > { %v521_v34 = vpop.f32.mrb[2].mxu0 }
 0x22f   : > { %596 = vrot.lane.b32.xlu0 %v2049_v32, %s1893_s11  ;;  %v1724_v35 = vpop.f32.mrb[3].mxu0  ;;  %v524_v37 = vmul.f32 0.25, %v2049_v32 }
 0x231   : > { %v529_v56 = vcombine.high %v524_v37, %v1891_v22  ;;  %v536_v62 = vrot.slane %v524_v37, %v2058_v45 }
 0x233   : > { %598 = vrot.lane.b32.xlu0 %v2049_v32, %s1894_s12  ;;  %v543_v5 = vrot.slane %v529_v56, %v2058_v45 }
 0x2a1   : > { %v2053_v36 = vpop.permute.xlu0 %596 }
 0x2a2   : > { %600 = vrot.lane.b32.xlu1 %v2053_v36, %s1894_s12 }
 0x2a5   : > { %v599_v43 = vpop.permute.xlu0 %598 }
 0x2a6   : > { %526 = vrot.lane.b32.xlu1 %v524_v37, %s1893_s11  ;;  %v604_v46 = vcombine.high %v599_v43, %v1891_v22  ;;  %v611_v49 = vrot.slane %v599_v43, %v2058_v45 }
 0x2a8   : > { %v618_v52 = vrot.slane %v604_v46, %v2058_v45 }
 0x314   : > { %v601_v47 = vpop.permute.xlu1 %600 }
 0x315   : > { %v619_v50 = vcombine.high %v601_v47, %v1891_v22  ;;  %v626_v51 = vrot.slane %v601_v47, %v2058_v45 }
 0x317   : > { %v633_v53 = vrot.slane %v619_v50, %v2058_v45  ;;  %v634_v54 = vcombine.low %v611_v49, %v626_v51  ;;  %v635_v55 = vcombine.high %v611_v49, %v626_v51 }
 0x318   : > { %v527_v57 = vpop.permute.xlu1 %526 }
 0x319   : > { %v642_v58 = vrot.slane %v634_v54, %v2062_v48  ;;  %v649_v59 = vrot.slane %v635_v55, %v2062_v48  ;;  %v650_v60 = vcombine.low %v618_v52, %v633_v53  ;;  %v651_v61 = vcombine.high %v618_v52, %v633_v53  ;;  %v1670_v55 = vld [vmem:[%s2230_s16] ss:$0 sm:$0xff] }
 0x31a   : > { %v544_v63 = vcombine.high %v527_v57, %v1891_v22  ;;  %v551_v0 = vrot.slane %v527_v57, %v2058_v45 }
 0x31b   : > { %v658_v1 = vrot.slane %v650_v60, %v2062_v48  ;;  %v665_v2 = vrot.slane %v651_v61, %v2062_v48  ;;  %v792_v3 = vcombine.low %v642_v58, %v649_v59  ;;  %v1666_v4 = vcombine.high %v642_v58, %v649_v59 }
 0x31c   : > { %v558_v6 = vrot.slane %v544_v63, %v2058_v45  ;;  %v559_v7 = vcombine.low %v536_v62, %v551_v0  ;;  %v560_v8 = vcombine.high %v536_v62, %v551_v0 }
 0x31d   : > { %v808_v9 = vcombine.low %v658_v1, %v665_v2  ;;  %v1667_v10 = vcombine.high %v658_v1, %v665_v2  ;;  %v799_v11 = vrot.slane %v792_v3, %v2058_v45  ;;  %v807_v12 = vrot.slane %v1666_v4, %v2058_v45 }
 0x31e   : > { %v567_v13 = vrot.slane %v559_v7, %v2062_v48  ;;  %v574_v14 = vrot.slane %v560_v8, %v2062_v48  ;;  %v575_v15 = vcombine.low %v543_v5, %v558_v6  ;;  %v576_v16 = vcombine.high %v543_v5, %v558_v6 }
 0x31f   : > { %v815_v17 = vrot.slane %v808_v9, %v2058_v45  ;;  %v823_v18 = vrot.slane %v1667_v10, %v2058_v45  ;;  %v824_v19 = vcombine.low %v799_v11, %v807_v12 }
 0x320   : > { %v583_v20 = vrot.slane %v575_v15, %v2062_v48  ;;  %v590_v21 = vrot.slane %v576_v16, %v2062_v48  ;;  %v742_v23 = vcombine.low %v567_v13, %v574_v14  ;;  %v1664_v25 = vcombine.high %v567_v13, %v574_v14 }
 0x321   : > { %v832_v26 = vcombine.low %v815_v17, %v823_v18  ;;  %v831_v34 = vrot.slane %v824_v19, %v2062_v48 }
 0x322   : > { %v749_v28 = vrot.slane %v742_v23, %v2058_v45  ;;  %v757_v30 = vrot.slane %v1664_v25, %v2058_v45  ;;  %v758_v31 = vcombine.low %v583_v20, %v590_v21  ;;  %v1665_v33 = vcombine.high %v583_v20, %v590_v21 }
 0x323   : > { %v839_v35 = vrot.slane %v832_v26, %v2062_v48 }
 0x324   : > { %v765_v37 = vrot.slane %v758_v31, %v2058_v45  ;;  %v773_v38 = vrot.slane %v1665_v33, %v2058_v45  ;;  %v774_v39 = vcombine.low %v749_v28, %v757_v30 }
 0x325   : > { %v840_v40 = vcombine.low %v831_v34, %v839_v35  ;;  %v841_v41 = vcombine.high %v831_v34, %v839_v35 }
 0x326   : > { %v782_v42 = vcombine.low %v765_v37, %v773_v38  ;;  %v781_v50 = vrot.slane %v774_v39, %v2062_v48 }
 0x327   : > { %v894_v43 = vpack.c.bf16 %v840_v40, %v840_v40  ;;  %v895_v44 = vpack.c.bf16 %v841_v41, %v841_v41 }
 0x328   : > { %v789_v46 = vrot.slane %v782_v42, %v2062_v48 }
 0x329   : > { %v908_v47 = vsel %vm903_vm3, %v894_v43, 0  ;;  %v954_v49 = vsel %vm903_vm3, %v895_v44, 0 }
 0x32a   : > { %1726 = vmatpush3.bf16.xpose.msra.mxu1 %v908_v47  ;;  %1732 = vmatpush3.bf16.xpose.msra.mxu0 %v954_v49  ;;  %v790_v51 = vcombine.low %v781_v50, %v789_v46  ;;  %v791_v52 = vcombine.high %v781_v50, %v789_v46 }
 0x32b   : > { %1737 = vmatprep.subr.bf16.mxu1 %v1891_v22  ;;  %1743 = vmatprep.subr.bf16.mxu0 %v1891_v22 }
 0x32c   : > { %v892_v53 = vpack.c.bf16 %v790_v51, %v790_v51  ;;  %v893_v54 = vpack.c.bf16 %v791_v52, %v791_v52 }
 0x331   : > { %1728 = vmatmul.mubr.msk.bf16.vlgmr.msra.gmra.mrb[0].mxu1 %vm903_vm3, %v892_v53  ;;  %1734 = vmatmul.mubr.msk.bf16.vlgmr.msra.gmra.mrb[4].mxu0 %vm903_vm3, %v893_v54 }
 0x332   : > { %1739 = vmatprep.mubr.msk.bf16.mxu1 %vm1892_vm1, %v1891_v22  ;;  %1745 = vmatprep.mubr.msk.bf16.mxu0 %vm1892_vm1, %v1891_v22 }
 0x404   : > { %v944_v56 = vpop.f32.mrb[0].mxu1  ;;  %v990_v57 = vpop.f32.mrb[4].mxu0 }
 0x405   : > { %v945_v58 = vadd.f32 %v1670_v55, %v944_v56  ;;  %v991_v59 = vadd.f32 %v1670_v55, %v990_v57  ;;  %v1729_v60 = vpop.f32.mrb[1].mxu1  ;;  %v1735_v61 = vpop.f32.mrb[5].mxu0 }
 0x406   : > { %v947_v62 = vpop.f32.mrb[2].mxu1  ;;  %v993_v63 = vpop.f32.mrb[6].mxu0 }
 0x407   : > { %v1730_v0 = vpop.f32.mrb[3].mxu1  ;;  %v1736_v1 = vpop.f32.mrb[7].mxu0  ;;  %v997_v2 = vsel %vm996_vm4, %v945_v58, -inf  ;;  %v1000_v3 = vsel %vm996_vm4, %v991_v59, -inf  ;;  %v1829_v62 = vld [vmem:[%s1996_s26] sm:$0xff]  }
 0x408   : > { %998 = vmax.xlane.f32.xlu0 %v997_v2  ;;  %1001 = vmax.xlane.f32.xlu1 %v1000_v3 }
 0x419   : > { %670 = vrot.lane.b32.xlu1 %v2049_v32, %s1897_s19 }
 0x495   : > { %v999_v4 = vpop.xlane.xlu0 %998  ;;  %v1002_v5 = vpop.xlane.xlu1 %1001 }
 0x496   : > { %v1003_v6 = vsub.f32 %v945_v58, %v999_v4  ;;  %v1004_v7 = vsub.f32 %v991_v59, %v1002_v5 }
 0x498   : > { %v1005_v8 = vmul.f32 1.442695, %v1003_v6  ;;  %v1007_v9 = vmul.f32 1.442695, %v1004_v7 }
 0x499   : > { %v671_v32 = vpop.permute.xlu1 %670 }
 0x49a   : > { %1837 = vpow2.f32 %v1005_v8  ;;  %v676_v16 = vcombine.high %v671_v32, %v1891_v22  ;;  %v683_v18 = vrot.slane %v671_v32, %v2058_v45 }
 0x49b   : > { %1839 = vpow2.f32 %v1007_v9 }
 0x49c   : > { %v690_v21 = vrot.slane %v676_v16, %v2058_v45 }
 0x4a4   : > { %v1838_v10 = vpop.eup %1837 }
 0x4a5   : > { %v1009_v11 = vsel %vm996_vm4, %v1838_v10, 0.0  ;;  %v1840_v12 = vpop.eup %1839 }
 0x4a6   : > { %1010 = vadd.xlane.f32.xlu0 %v1009_v11  ;;  %v1012_v13 = vsel %vm996_vm4, %v1840_v12, 0.0 }
 0x4aa   : > { %1013 = vadd.xlane.f32.xlu0 %v1012_v13 }
 0x4c0   : > { %672 = vrot.lane.b32.xlu0 %v2053_v36, %s1897_s19 }
 0x533   : > { %v1011_v14 = vpop.xlane.xlu0 %1010 }
 0x534   : > { %1841 = vrcp.f32 %v1011_v14 }
 0x537   : > { %v1014_v15 = vpop.xlane.xlu0 %1013 }
 0x538   : > { %1843 = vrcp.f32 %v1014_v15 }
 0x53b   : > { %v673_v17 = vpop.permute.xlu0 %672 }
 0x53c   : > { %v691_v19 = vcombine.high %v673_v17, %v1891_v22  ;;  %v698_v20 = vrot.slane %v673_v17, %v2058_v45 }
 0x53e   : > { %v705_v23 = vrot.slane %v691_v19, %v2058_v45  ;;  %v706_v25 = vcombine.low %v683_v18, %v698_v20  ;;  %v707_v26 = vcombine.high %v683_v18, %v698_v20  ;;  %v1842_v47 = vpop.eup %1841  ;;  %v1830_v18 = vld [vmem:[%s1996_s26 + $0x8] sm:$0xff]  }
 0x53f   : > { %v1017_v54 = vmul.f32 %v1842_v47, %v1838_v10 }
 0x540   : > { %v714_v36 = vrot.slane %v706_v25, %v2062_v48  ;;  %v721_v28 = vrot.slane %v707_v26, %v2062_v48  ;;  %v722_v30 = vcombine.low %v690_v21, %v705_v23  ;;  %v723_v31 = vcombine.high %v690_v21, %v705_v23 }
 0x541   : > { %v1019_v60 = vpack.c.bf16 %v1017_v54, %v1017_v54 }
 0x542   : > { %v730_v33 = vrot.slane %v722_v30, %v2062_v48  ;;  %v737_v34 = vrot.slane %v723_v31, %v2062_v48  ;;  %v842_v35 = vcombine.low %v714_v36, %v721_v28  ;;  %v1668_v37 = vcombine.high %v714_v36, %v721_v28  ;;  %v1844_v51 = vpop.eup %1843 }
 0x543   : > { %v1018_v55 = vmul.f32 %v1844_v51, %v1840_v12 }
 0x544   : > { %v849_v38 = vrot.slane %v842_v35, %v2058_v45  ;;  %v857_v39 = vrot.slane %v1668_v37, %v2058_v45  ;;  %v858_v40 = vcombine.low %v730_v33, %v737_v34  ;;  %v1669_v41 = vcombine.high %v730_v33, %v737_v34 }
 0x545   : > { %v1020_v61 = vpack.c.bf16 %v1018_v55, %v1018_v55 }
 0x546   : > { %v865_v42 = vrot.slane %v858_v40, %v2058_v45  ;;  %v873_v43 = vrot.slane %v1669_v41, %v2058_v45  ;;  %v874_v44 = vcombine.low %v849_v38, %v857_v39 }
 0x548   : > { %v882_v46 = vcombine.low %v865_v42, %v873_v43  ;;  %v881_v49 = vrot.slane %v874_v44, %v2062_v48 }
 0x54a   : > { %v889_v50 = vrot.slane %v882_v46, %v2062_v48 }
 0x54c   : > { %v890_v52 = vcombine.low %v881_v49, %v889_v50  ;;  %v891_v53 = vcombine.high %v881_v49, %v889_v50 }
 0x54e   : > { %v1021_v56 = vpack.c.bf16 %v890_v52, %v890_v52  ;;  %v1022_v57 = vpack.c.bf16 %v891_v53, %v891_v53 }
 0x550   : > { %v1028_v58 = vsel %vm1026_vm5, %v1021_v56, 0  ;;  %v1074_v59 = vsel %vm1026_vm5, %v1022_v57, 0  ;;  %v1831_v57 = vld [vmem:[%s2001_s14] sm:$0xff]  }
 0x551   : > { %1738 = vmatpush3.bf16.msra.mxu1 %v1028_v58  ;;  %1744 = vmatpush3.bf16.msra.mxu0 %v1074_v59  ;;  %v1832_v58 = vld [vmem:[%s2001_s14 + $0x8] sm:$0xff]  }
 0x552   : > { %1749 = vmatprep.subr.bf16.mxu1 %v1891_v22  ;;  %1757 = vmatprep.subr.bf16.mxu0 %v1891_v22 }
 0x554   : > { %1740 = vmatmul.mubr.msk.bf16.vlgmr.msra.gmra.mrb[4].mxu1 %vm996_vm4, %v1019_v60  ;;  %1746 = vmatmul.mubr.msk.bf16.vlgmr.msra.gmra.mrb[8].mxu0 %vm996_vm4, %v1020_v61  ;;  %v1318_v61 = vsub.s32 2, %v2042_v27 }
 0x555   : > { %1753 = vmatprep.mubr.msk.bf16.mxu1 %vm1892_vm1, %v1891_v22  ;;  %1761 = vmatprep.mubr.msk.bf16.mxu0 %vm1892_vm1, %v1891_v22 }
 0x556   : > { %1750 = vmatpush3.bf16.msra.mxu1 %v1829_v62  ;;  %1758 = vmatpush3.bf16.msra.mxu0 %v1831_v57  ;;  %v1323_v62 = vsub.s32 3, %v2042_v27 }
 0x557   : > { %1751 = vmatprep.subr.bf16.mxu1 %v1891_v22  ;;  %1759 = vmatprep.subr.bf16.mxu0 %v1891_v22 }
 0x55a   : > { %1752 = vmatpush3.bf16.msra.mxu1 %v1830_v18  ;;  %1760 = vmatpush3.bf16.msra.mxu0 %v1832_v58 }
 0x55b   : > { %1765 = vmatprep.subr.bf16.mxu1 %v1891_v22 }
 0x627   : > { %v1064_v63 = vpop.f32.mrb[4].mxu1  ;;  %v1110_v0 = vpop.f32.mrb[8].mxu0 }
 0x628   : > { %v1116_v1 = vcombine.high %v1064_v63, %v1891_v22  ;;  %v1123_v2 = vrot.slane %v1064_v63, %v2058_v45  ;;  %v1131_v3 = vcombine.high %v1110_v0, %v1891_v22  ;;  %v1138_v4 = vrot.slane %v1110_v0, %v2058_v45  ;;  %v1741_v5 = vpop.f32.mrb[5].mxu1  ;;  %v1747_v6 = vpop.f32.mrb[9].mxu0 }
 0x629   : > { %v1067_v7 = vpop.f32.mrb[6].mxu1  ;;  %v1113_v8 = vpop.f32.mrb[10].mxu0  ;;  %v1319_v63 = vrot.slane %v2046_v29, %v1318_v61  ;;  %v1833_v6 = vld [vmem:[%s2006_s18] sm:$0xff]  }
 0x62a   : > { %v1130_v9 = vrot.slane %v1116_v1, %v2058_v45  ;;  %v1145_v10 = vrot.slane %v1131_v3, %v2058_v45  ;;  %v1146_v11 = vcombine.low %v1123_v2, %v1138_v4  ;;  %v1147_v12 = vcombine.high %v1123_v2, %v1138_v4  ;;  %v1742_v13 = vpop.f32.mrb[7].mxu1  ;;  %v1748_v14 = vpop.f32.mrb[11].mxu0  ;;  %v1834_v7 = vld [vmem:[%s2006_s18 + $0x8] sm:$0xff]   ;;  %v1835_v8 = vld [vmem:[%s2006_s18 + $0x10] sm:$0xff]  }
 0x62b   : > { %v1324_v2 = vrot.slane %v2046_v29, %v1323_v62 }
 0x62c   : > { %v1154_v32 = vrot.slane %v1146_v11, %v2062_v48  ;;  %v1161_v15 = vrot.slane %v1147_v12, %v2062_v48  ;;  %v1162_v16 = vcombine.low %v1130_v9, %v1145_v10  ;;  %v1163_v17 = vcombine.high %v1130_v9, %v1145_v10  ;;  %v1836_v9 = vld [vmem:[%s2006_s18 + $0x18] sm:$0xff]  }
 0x62d   : > { %v1333_v10 = vsub.s32 4, %v2042_v27 }
 0x62e   : > { %v1170_v19 = vrot.slane %v1162_v16, %v2062_v48  ;;  %v1177_v20 = vrot.slane %v1163_v17, %v2062_v48  ;;  %v1182_v21 = vcombine.low %v1154_v32, %v1161_v15  ;;  %v1675_v23 = vcombine.high %v1154_v32, %v1161_v15 }
 0x62f   : > { %v1334_v11 = vrot.slane %v2046_v29, %v1333_v10 }
 0x630   : > { %v1189_v25 = vrot.slane %v1182_v21, %v2058_v45  ;;  %v1197_v26 = vrot.slane %v1675_v23, %v2058_v45  ;;  %v1198_v36 = vcombine.low %v1170_v19, %v1177_v20  ;;  %v1676_v28 = vcombine.high %v1170_v19, %v1177_v20 }
 0x632   : > { %v1205_v30 = vrot.slane %v1198_v36, %v2058_v45  ;;  %v1213_v31 = vrot.slane %v1676_v28, %v2058_v45  ;;  %v1214_v33 = vcombine.low %v1189_v25, %v1197_v26  ;;  %v1244_v45 = vsub.s32 1, %v2042_v27 }
 0x633   : > { %v1410_v36 = vsub.s32 5, %v2042_v27 }
 0x634   : > { %v1222_v34 = vcombine.low %v1205_v30, %v1213_v31  ;;  %v1221_v35 = vrot.slane %v1214_v33, %v2062_v48  ;;  %v1245_v43 = vrot.slane %v2046_v29, %v1244_v45 }
 0x635   : > { %v1411_v28 = vrot.slane %v2046_v29, %v1410_v36 }
 0x636   : > { %v1229_v37 = vrot.slane %v1222_v34, %v2062_v48 }
 0x638   : > { %v1231_v38 = vcombine.high %v1221_v35, %v1229_v37  ;;  %v1230_v39 = vcombine.low %v1221_v35, %v1229_v37 }
 0x63a   : > { %1233 = vrot.lane.b32.xlu1 %v1231_v38, %s1898_s28 }
 0x6ac   : > { %v1234_v40 = vpop.permute.xlu1 %1233 }
 0x6ad   : > { %v1236_v41 = vsel %vm903_vm3, %v1230_v39, %v1234_v40 }
 0x6ae   : > { %v1237_v42 = vpack.c.bf16 %v1236_v41, %v1236_v41 }
 0x6b0   : > { %1754 = vmatmul.mubr.msk.bf16.vlgmr.msra.gmra.mrb[8].mxu1 %vm480_vm2, %v1237_v42 }
 0x6b1   : > { %1773 = vmatprep.mubr.msk.bf16.mxu1 %vm1892_vm1, %v1891_v22  ;;  %1766 = vmatpush3.bf16.msra.mxu1 %v1833_v6 }
 0x6b2   : > { %1767 = vmatprep.subr.bf16.mxu1 %v1891_v22 }
 0x6b5   : > { %1768 = vmatpush3.bf16.msra.mxu1 %v1834_v7 }
 0x6b6   : > { %1769 = vmatprep.subr.bf16.mxu1 %v1891_v22 }
 0x6b9   : > { %1770 = vmatpush3.bf16.msra.mxu1 %v1835_v8 }
 0x6ba   : > { %1771 = vmatprep.subr.bf16.mxu1 %v1891_v22 }
 0x6bd   : > { %1772 = vmatpush3.bf16.msra.mxu1 %v1836_v9 }
 0x783   : > { %v1295_v44 = vpop.f32.mrb[8].mxu1 }
 0x784   : > { %v1296_v48 = vadd.f32 %v1295_v44, %v1245_v43  ;;  %v1755_v46 = vpop.f32.mrb[9].mxu1 }
 0x785   : > { %v1298_v47 = vpop.f32.mrb[10].mxu1  ;;  %v1496_v46 = vsub.s32 6, %v2042_v27 }
 0x786   : > { %v1756_v49 = vpop.f32.mrb[11].mxu1  ;;  %v1301_v50 = vadd.f32 %v1296_v48, %v2031_v24  ;;  %v1501_v47 = vsub.s32 7, %v2042_v27 }
 0x787   : > { %v1497_v49 = vrot.slane %v2046_v29, %v1496_v46 }
 0x788   : > { %v1302_v51 = vsel %vm480_vm2, %v1301_v50, 0.0 }
 0x789   : > { %1303 = vadd.xlane.f32.xlu1 %v1302_v51  ;;  %v1502_v51 = vrot.slane %v2046_v29, %v1501_v47 }
 0x816   : > { %v1304_v52 = vpop.xlane.xlu1 %1303 }
 0x817   : > { %v1306_v53 = vmul.f32 0.03125, %v1304_v52 }
 0x819   : > { %v1307_v54 = vsub.f32 %v1301_v50, %v1306_v53 }
 0x81b   : > { %v1308_v55 = vmul.f32 %v1307_v54, %v1307_v54 }
 0x81d   : > { %v1309_v56 = vsel %vm480_vm2, %v1308_v55, 0.0 }
 0x81e   : > { %1310 = vadd.xlane.f32.xlu0 %v1309_v56 }
 0x8ab   : > { %v1311_v59 = vpop.xlane.xlu0 %1310 }
 0x8ac   : > { %v1312_v60 = vmul.f32 0.03125, %v1311_v59 }
 0x8ae   : > { %v1313_v24 = vadd.f32 1e-12, %v1312_v60 }
 0x8b0   : > { %1845 = vrsqrt.f32 %v1313_v24 }
 0x8ba   : > { %v1846_v0 = vpop.eup %1845 }
 0x8bb   : > { %v1315_v1 = vmul.f32 %v1846_v0, %v1307_v54 }
 0x8bd   : > { %v1320_v3 = vmul.f32 %v1319_v63, %v1315_v1 }
 0x8bf   : > { %v1325_v4 = vadd.f32 %v1324_v2, %v1320_v3 }
 0x8c1   : > { %v1326_v5 = vpack.c.bf16 %v1325_v4, %v1325_v4 }
 0x8c3   : > { %1762 = vmatmul.mubr.msk.bf16.vlgmr.msra.gmra.mrb[12].mxu0 %vm480_vm2, %v1326_v5 }
 0x996   : > { %v1384_v12 = vpop.f32.mrb[12].mxu0 }
 0x997   : > { %v1385_v13 = vadd.f32 %v1384_v12, %v1334_v11  ;;  %v1763_v14 = vpop.f32.mrb[13].mxu0 }
 0x998   : > { %v1387_v32 = vpop.f32.mrb[14].mxu0 }
 0x999   : > { %v1390_v15 = vmul.f32 %v1385_v13, %v1385_v13  ;;  %v1764_v16 = vpop.f32.mrb[15].mxu0 }
 0x99b   : > { %v1391_v17 = vmul.f32 %v1390_v15, %v1385_v13 }
 0x99d   : > { %v1392_v18 = vmul.f32 0.044715, %v1391_v17 }
 0x99f   : > { %v1393_v19 = vadd.f32 %v1392_v18, %v1385_v13 }
 0x9a1   : > { %v1394_v20 = vmul.f32 0.7978846, %v1393_v19 }
 0x9a3   : > { %1847 = vtanh.f32 %v1394_v20 }
 0x9ad   : > { %v1848_v21 = vpop.eup %1847 }
 0x9ae   : > { %v1396_v23 = vadd.f32 1.0, %v1848_v21 }
 0x9b0   : > { %v1397_v22 = vmul.f32 0.5, %v1396_v23 }
 0x9b2   : > { %v1398_v25 = vmul.f32 %v1397_v22, %v1385_v13 }
 0x9b4   : > { %v1399_v26 = vpack.c.bf16 %v1398_v25, %v1398_v25 }
 0x9b6   : > { %1774 = vmatmul.mubr.msk.bf16.vlgmr.msra.gmra.mrb[12].mxu1 %vm1436_vm6, %v1399_v26 }
 0xa89   : > { %v1474_v30 = vpop.f32.mrb[12].mxu1 }
 0xa8a   : > { %v1475_v31 = vadd.f32 %v1474_v30, %v1411_v28  ;;  %v1775_v33 = vpop.f32.mrb[13].mxu1 }
 0xa8b   : > { %v1477_v34 = vpop.f32.mrb[14].mxu1 }
 0xa8c   : > { %v1776_v35 = vpop.f32.mrb[15].mxu1  ;;  %v1480_v37 = vadd.f32 %v1475_v31, %v1325_v4 }
 0xa8e   : > { %v1481_v38 = vsel %vm480_vm2, %v1480_v37, 0.0 }
 0xa8f   : > { %1482 = vadd.xlane.f32.xlu0 %v1481_v38 }
 0xb1c   : > { %v1483_v39 = vpop.xlane.xlu0 %1482 }
 0xb1d   : > { %v1484_v40 = vmul.f32 0.03125, %v1483_v39 }
 0xb1f   : > { %v1485_v41 = vsub.f32 %v1480_v37, %v1484_v40 }
 0xb21   : > { %v1486_v42 = vmul.f32 %v1485_v41, %v1485_v41 }
 0xb23   : > { %v1487_v45 = vsel %vm480_vm2, %v1486_v42, 0.0 }
 0xb24   : > { %1488 = vadd.xlane.f32.xlu1 %v1487_v45 }
 0xbb1   : > { %v1489_v43 = vpop.xlane.xlu1 %1488 }
 0xbb2   : > { %v1490_v44 = vmul.f32 0.03125, %v1489_v43 }
 0xbb4   : > { %v1491_v48 = vadd.f32 1e-12, %v1490_v44 }
 0xbb6   : > { %1849 = vrsqrt.f32 %v1491_v48 }
 0xbc0   : > { %v1850_v50 = vpop.eup %1849 }
 0xbc1   : > { %v1493_v52 = vmul.f32 %v1850_v50, %v1485_v41  ;;  %1508 = sbr.rel (%p1688_p8) target bundleno = 3017 (0xbc9), region = 60 }
 0xbc3   : > { %v1498_v53 = vmul.f32 %v1497_v49, %v1493_v52 }
 0xbc5   : > { %v1503_v54 = vadd.f32 %v1502_v51, %v1498_v53 }
 0xbc7   : > { %1504 = vst.msk [vmem:[#allocation2] sm:$0xff] %vm480_vm2, %v1503_v54  ;;  %v1509_v55 = vsel (!%p1688_p8), %vm480_vm2, %v1503_v54, 0.0 }
 0xbc8   : > { %1510 = vst [vmem:[%s2016_s4] sm:$0xff] %v1509_v55 }
 0xbc9 PF: > { %s18_s9 = sadd.s32 1, %s1889_s9   ;;  %s2231_s20 = sld [smem:[#allocation3_spill]] }
 0xbca   : > { %p15_p9 = scmp.ge.s32.totalorder %s18_s9, 6   ;;  %s2232_s23 = sld [smem:[#allocation4_spill]] }
 0xbcb   : > { %s2233_s27 = smov %s1881_s29  ;;  %s2234_s28 = smov %s1885_s30 }
 0xbcc   :  { %17 = sbr.rel (!%p15_p9) target bundleno = 4 (0x4), region = 108 }
 0xbcf   : > { %s2235_s29 = smov %s2231_s20 }
 0xbd0   : > { %s2236_s30 = smov %s2232_s23 }

</bundles_post_ra>
